<compile_context>
chip_gen: v5e
topology: v5e:2x2
jax: 0.10.0
libtpu: 0.0.40
codegen_flags: <defaults>
</compile_context>

<pallas_src>
import jax
import jax.numpy as jnp
from jax.experimental import pallas as pl
from jax.experimental.pallas import tpu as pltpu


def _mlp_kernel(x_ref, w1_ref, b1_ref, w2_ref, b2_ref, w3_ref, b3_ref, o_ref):
    # out = relu(relu(x @ W1 + b1) @ W2 + b2) @ W3 + b3
    x = x_ref[...].astype(jnp.bfloat16)                          # (TILE_M, K) cast in-kernel
    h1 = jnp.dot(x, w1_ref[...], preferred_element_type=jnp.float32) + b1_ref[...]
    h1 = jnp.maximum(h1, 0.0).astype(jnp.bfloat16)
    h2 = jnp.dot(h1, w2_ref[...], preferred_element_type=jnp.float32) + b2_ref[...]
    h2 = jnp.maximum(h2, 0.0).astype(jnp.bfloat16)
    out = jnp.dot(h2, w3_ref[...], preferred_element_type=jnp.float32) + b3_ref[...]
    o_ref[...] = out.astype(o_ref.dtype)                         # (TILE_M, N) narrow store


def _tile_m_for(batch):
    # >=256 rows fills the 256-wide MXU (v6e/v7x) and keeps small batches to a
    # single grid step; for bigger batches keep >=2 tiles (v7x has 2 TCs) and
    # grow the tile (cap 1024 — trivially within scoped VMEM, ~85%+ of the
    # measured pipeline roofline).
    if batch <= 256:
        return 256
    tile = ((pl.cdiv(batch, 2) + 255) // 256) * 256
    return min(tile, 1024)


def prepare_params(w1, b1, w2, b2, w3, b3):
    """One-time parameter prep (hoisted out of the per-call hot path):
    cast weights to bf16 for the MXU; biases stay f32 (added to f32 accum).
    Weights are already [in, out]; no padding needed (full-extent K/N blocks)."""
    return (w1.astype(jnp.bfloat16), b1,
            w2.astype(jnp.bfloat16), b2,
            w3.astype(jnp.bfloat16), b3)


@jax.jit
def hockey_ai_forward(x, w1, b1, w2, b2, w3, b3):
    batch, in_size = x.shape
    hidden = w1.shape[1]
    out_size = w3.shape[1]

    tile_m = _tile_m_for(batch)
    grid = (pl.cdiv(batch, tile_m),)

    return pl.pallas_call(
        _mlp_kernel,
        out_shape=jax.ShapeDtypeStruct((batch, out_size), jnp.float32),
        grid_spec=pltpu.PrefetchScalarGridSpec(
            num_scalar_prefetch=0,
            grid=grid,
            in_specs=[
                # batch-tiled activations; last dim = full array dim (no K pad)
                pl.BlockSpec((tile_m, in_size), lambda i: (i, 0)),
                # weights / biases: constant block index -> resident in VMEM
                pl.BlockSpec((in_size, hidden), lambda i: (0, 0)),
                pl.BlockSpec((1, hidden), lambda i: (0, 0)),
                pl.BlockSpec((hidden, hidden), lambda i: (0, 0)),
                pl.BlockSpec((1, hidden), lambda i: (0, 0)),
                pl.BlockSpec((hidden, out_size), lambda i: (0, 0)),
                pl.BlockSpec((1, out_size), lambda i: (0, 0)),
            ],
            # narrow (tile_m, out_size) output block: 16x less writeback than a
            # 128-lane-padded block; partial last block rows are clipped.
            out_specs=pl.BlockSpec((tile_m, out_size), lambda i: (i, 0)),
        ),
        compiler_params=pltpu.CompilerParams(
            dimension_semantics=("parallel",)),  # shard batch tiles across TCs
    )(x, w1, b1, w2, b2, w3, b3)


def init_params(key, input_size, hidden, output_size):
    # Deterministic synthetic init (uniform, roughly PyTorch-Linear-like scale).
    ks = jax.random.split(key, 6)

    def lin(kw, kb, fan_in, fan_out):
        bound = 1.0 / jnp.sqrt(fan_in)
        w = jax.random.uniform(kw, (fan_in, fan_out), jnp.float32, -bound, bound)
        b = jax.random.uniform(kb, (1, fan_out), jnp.float32, -bound, bound)
        return w, b

    w1, b1 = lin(ks[0], ks[1], input_size, hidden)
    w2, b2 = lin(ks[2], ks[3], hidden, hidden)
    w3, b3 = lin(ks[4], ks[5], hidden, output_size)
    return w1, b1, w2, b2, w3, b3


if __name__ == "__main__":
    INPUT_SIZE = 32    # observation vector size
    OUTPUT_SIZE = 8    # action count
    HIDDEN = 128
    BATCH = 200        # not a tile multiple: exercises the partial-block path

    key = jax.random.PRNGKey(0)
    k_x, k_p = jax.random.split(key)
    x = jax.random.normal(k_x, (BATCH, INPUT_SIZE), jnp.float32)
    raw_params = init_params(k_p, INPUT_SIZE, HIDDEN, OUTPUT_SIZE)

    # One-time prep (bf16 weight cast) outside the per-call hot path.
    params = jax.block_until_ready(prepare_params(*raw_params))

    out = hockey_ai_forward(x, *params)
    out = jax.block_until_ready(out)

    # Reference with identical numerics (bf16 operands, f32 accumulate, f32
    # bias/ReLU) so the comparison isolates kernel correctness.
    w1, b1, w2, b2, w3, b3 = raw_params
    xb = x.astype(jnp.bfloat16)
    w1b, w2b, w3b = (w.astype(jnp.bfloat16) for w in (w1, w2, w3))
    h1 = jnp.maximum(jnp.dot(xb, w1b, preferred_element_type=jnp.float32) + b1, 0.0)
    h1 = h1.astype(jnp.bfloat16)
    h2 = jnp.maximum(jnp.dot(h1, w2b, preferred_element_type=jnp.float32) + b2, 0.0)
    h2 = h2.astype(jnp.bfloat16)
    ref = jnp.dot(h2, w3b, preferred_element_type=jnp.float32) + b3

    assert out.shape == (BATCH, OUTPUT_SIZE)
    assert jnp.allclose(out, ref, atol=2e-2, rtol=2e-2), float(
        jnp.max(jnp.abs(out - ref)))

    print("KERNEL_OK")
</pallas_src>

<mosaic_0001>
module attributes {stable_mosaic.version = 11 : i64} {
  func.func @_mlp_kernel(%arg0: i32, %arg1: memref<256x32xf32, #tpu.memory_space<vmem>>, %arg2: memref<32x128xbf16, #tpu.memory_space<vmem>>, %arg3: memref<1x128xf32, #tpu.memory_space<vmem>>, %arg4: memref<128x128xbf16, #tpu.memory_space<vmem>>, %arg5: memref<1x128xf32, #tpu.memory_space<vmem>>, %arg6: memref<128x8xbf16, #tpu.memory_space<vmem>>, %arg7: memref<1x8xf32, #tpu.memory_space<vmem>>, %arg8: memref<256x8xf32, #tpu.memory_space<vmem>>) attributes {dimension_semantics = [#tpu.dimension_semantics<parallel>], iteration_bounds = array<i64: 1>, scalar_prefetch = 0 : i64, scratch_operands = 0 : i64, tpu.core_type = #tpu.core_type<tc>, window_params = [{transform_indices = @transform_0, window_bounds = array<i64: 256, 32>}, {pipeline_mode = #tpu.pipeline_mode<synchronous>, transform_indices = @transform_1, window_bounds = array<i64: 32, 128>}, {pipeline_mode = #tpu.pipeline_mode<synchronous>, transform_indices = @transform_2, window_bounds = array<i64: 1, 128>}, {pipeline_mode = #tpu.pipeline_mode<synchronous>, transform_indices = @transform_3, window_bounds = array<i64: 128, 128>}, {pipeline_mode = #tpu.pipeline_mode<synchronous>, transform_indices = @transform_4, window_bounds = array<i64: 1, 128>}, {pipeline_mode = #tpu.pipeline_mode<synchronous>, transform_indices = @transform_5, window_bounds = array<i64: 128, 8>}, {pipeline_mode = #tpu.pipeline_mode<synchronous>, transform_indices = @transform_6, window_bounds = array<i64: 1, 8>}, {transform_indices = @transform_7, window_bounds = array<i64: 256, 8>}]} {
    %c0 = arith.constant 0 : index
    %c0_0 = arith.constant 0 : index
    %0 = vector.load %arg1[%c0, %c0_0] : memref<256x32xf32, #tpu.memory_space<vmem>>, vector<256x32xf32>
    %1 = arith.truncf %0 : vector<256x32xf32> to vector<256x32xbf16>
    %c0_1 = arith.constant 0 : index
    %c0_2 = arith.constant 0 : index
    %2 = vector.load %arg2[%c0_1, %c0_2] : memref<32x128xbf16, #tpu.memory_space<vmem>>, vector<32x128xbf16>
    %cst = arith.constant dense<0.000000e+00> : vector<256x128xf32>
    %3 = tpu.matmul %1, %2, %cst {dimension_numbers = #tpu.dot_dimension_numbers<[1], [0], [0], [1], [0, 0, 1, 1], [], []>} : vector<256x32xbf16>, vector<32x128xbf16>, vector<256x128xf32> -> vector<256x128xf32>
    %c0_3 = arith.constant 0 : index
    %c0_4 = arith.constant 0 : index
    %4 = vector.load %arg3[%c0_3, %c0_4] : memref<1x128xf32, #tpu.memory_space<vmem>>, vector<1x128xf32>
    %5 = vector.broadcast %4 : vector<1x128xf32> to vector<256x128xf32>
    %6 = arith.addf %3, %5 : vector<256x128xf32>
    %cst_5 = arith.constant 0.000000e+00 : f32
    %7 = vector.broadcast %cst_5 : f32 to vector<256x128xf32>
    %8 = arith.maximumf %6, %7 : vector<256x128xf32>
    %9 = arith.truncf %8 : vector<256x128xf32> to vector<256x128xbf16>
    %c0_6 = arith.constant 0 : index
    %c0_7 = arith.constant 0 : index
    %10 = vector.load %arg4[%c0_6, %c0_7] : memref<128x128xbf16, #tpu.memory_space<vmem>>, vector<128x128xbf16>
    %cst_8 = arith.constant dense<0.000000e+00> : vector<256x128xf32>
    %11 = tpu.matmul %9, %10, %cst_8 {dimension_numbers = #tpu.dot_dimension_numbers<[1], [0], [0], [1], [0, 0, 1, 1], [], []>} : vector<256x128xbf16>, vector<128x128xbf16>, vector<256x128xf32> -> vector<256x128xf32>
    %c0_9 = arith.constant 0 : index
    %c0_10 = arith.constant 0 : index
    %12 = vector.load %arg5[%c0_9, %c0_10] : memref<1x128xf32, #tpu.memory_space<vmem>>, vector<1x128xf32>
    %13 = vector.broadcast %12 : vector<1x128xf32> to vector<256x128xf32>
    %14 = arith.addf %11, %13 : vector<256x128xf32>
    %cst_11 = arith.constant 0.000000e+00 : f32
    %15 = vector.broadcast %cst_11 : f32 to vector<256x128xf32>
    %16 = arith.maximumf %14, %15 : vector<256x128xf32>
    %17 = arith.truncf %16 : vector<256x128xf32> to vector<256x128xbf16>
    %c0_12 = arith.constant 0 : index
    %c0_13 = arith.constant 0 : index
    %18 = vector.load %arg6[%c0_12, %c0_13] : memref<128x8xbf16, #tpu.memory_space<vmem>>, vector<128x8xbf16>
    %cst_14 = arith.constant dense<0.000000e+00> : vector<256x8xf32>
    %19 = tpu.matmul %17, %18, %cst_14 {dimension_numbers = #tpu.dot_dimension_numbers<[1], [0], [0], [1], [0, 0, 1, 1], [], []>} : vector<256x128xbf16>, vector<128x8xbf16>, vector<256x8xf32> -> vector<256x8xf32>
    %c0_15 = arith.constant 0 : index
    %c0_16 = arith.constant 0 : index
    %20 = vector.load %arg7[%c0_15, %c0_16] : memref<1x8xf32, #tpu.memory_space<vmem>>, vector<1x8xf32>
    %21 = vector.broadcast %20 : vector<1x8xf32> to vector<256x8xf32>
    %22 = arith.addf %19, %21 : vector<256x8xf32>
    %c0_17 = arith.constant 0 : index
    %c0_18 = arith.constant 0 : index
    %23 = vector.load %arg8[%c0_17, %c0_18] : memref<256x8xf32, #tpu.memory_space<vmem>>, vector<256x8xf32>
    tpu.vector_store %arg8[%c0_17, %c0_18], %22 {strides = array<i32>} : memref<256x8xf32, #tpu.memory_space<vmem>>, vector<256x8xf32>,
    return
  }
  func.func @transform_0(%arg0: i32) -> (i32, i32) {
    %c0_i32 = arith.constant 0 : i32
    %c0_i32_0 = arith.constant 0 : i32
    return %arg0, %c0_i32 : i32, i32
  }
  func.func @transform_1(%arg0: i32) -> (i32, i32) {
    %c0_i32 = arith.constant 0 : i32
    %c0_i32_0 = arith.constant 0 : i32
    %c0_i32_1 = arith.constant 0 : i32
    return %c0_i32, %c0_i32_0 : i32, i32
  }
  func.func @transform_2(%arg0: i32) -> (i32, i32) {
    %c0_i32 = arith.constant 0 : i32
    %c0_i32_0 = arith.constant 0 : i32
    %c0_i32_1 = arith.constant 0 : i32
    return %c0_i32, %c0_i32_0 : i32, i32
  }
  func.func @transform_3(%arg0: i32) -> (i32, i32) {
    %c0_i32 = arith.constant 0 : i32
    %c0_i32_0 = arith.constant 0 : i32
    %c0_i32_1 = arith.constant 0 : i32
    return %c0_i32, %c0_i32_0 : i32, i32
  }
  func.func @transform_4(%arg0: i32) -> (i32, i32) {
    %c0_i32 = arith.constant 0 : i32
    %c0_i32_0 = arith.constant 0 : i32
    %c0_i32_1 = arith.constant 0 : i32
    return %c0_i32, %c0_i32_0 : i32, i32
  }
  func.func @transform_5(%arg0: i32) -> (i32, i32) {
    %c0_i32 = arith.constant 0 : i32
    %c0_i32_0 = arith.constant 0 : i32
    %c0_i32_1 = arith.constant 0 : i32
    return %c0_i32, %c0_i32_0 : i32, i32
  }
  func.func @transform_6(%arg0: i32) -> (i32, i32) {
    %c0_i32 = arith.constant 0 : i32
    %c0_i32_0 = arith.constant 0 : i32
    %c0_i32_1 = arith.constant 0 : i32
    return %c0_i32, %c0_i32_0 : i32, i32
  }
  func.func @transform_7(%arg0: i32) -> (i32, i32) {
    %c0_i32 = arith.constant 0 : i32
    %c0_i32_0 = arith.constant 0 : i32
    return %arg0, %c0_i32 : i32, i32
  }
}

</mosaic_0001>

<bundles_post_ra>
// kernel: hockey_ai_forward.1
= control target key start
LH: loop header
LB: loop body
LE: loop exit
PB: predicated region body
PF: predicated region fallthrough
CT: control target
= control target key end

     0   :  { %vm95_vm0 = vcmask 261120   ;;  %vm643_vm1 = vcmask 64512   ;;  %s1350_s0 = inlined_call_operand.vmem [shape: f32[200,32], index: 0, kind: input, shape index: {}]   ;;  %s1351_s1 = inlined_call_operand.vmem [shape: bf16[32,128], index: 1, kind: input, shape index: {}]   ;;  %s1352_s2 = inlined_call_operand.vmem [shape: f32[1,128], index: 2, kind: input, shape index: {}]   ;;  %s1353_s3 = inlined_call_operand.vmem [shape: bf16[128,128], index: 3, kind: input, shape index: {}]   ;;  %s1354_s4 = inlined_call_operand.vmem [shape: f32[1,128], index: 4, kind: input, shape index: {}]   ;;  %s1355_s5 = inlined_call_operand.vmem [shape: bf16[128,8], index: 5, kind: input, shape index: {}]   ;;  %s1356_s6 = inlined_call_operand.vmem [shape: f32[1,8], index: 6, kind: input, shape index: {}]   ;;  %s1357_s7 = inlined_call_operand.vmem [shape: f32[200,8], index: 7, kind: output, shape index: {}]  }
   0x1   :  { %v902_v0 = vld [vmem:[%s1351_s1 + $0x8] sm:$0xff]  ;;  %v901_v1 = vld [vmem:[%s1351_s1] sm:$0xff]  ;;  %v29_v5 = vld [vmem:[%s1350_s0 + $0x10] sm:$0xff] }
   0x2   :  { %150 = vmatpush.bf16.msra.mxu0 %v902_v0  ;;  %v27_v2 = vld [vmem:[%s1350_s0] sm:$0xff]  ;;  %v28_v3 = vld [vmem:[%s1350_s0 + $0x8] sm:$0xff]  ;;  %919 = vmatpush.bf16.msra.mxu3 %v902_v0  ;;  %v30_v6 = vld [vmem:[%s1350_s0 + $0x18] sm:$0xff] }
   0x3   :  { %v59_v4 = vpack.c.bf16 %v28_v3, %v27_v2  ;;  %v60_v7 = vpack.c.bf16 %v30_v6, %v29_v5  ;;  %v31_v8 = vld [vmem:[%s1350_s0 + $0x20] sm:$0xff]  ;;  %v32_v9 = vld [vmem:[%s1350_s0 + $0x28] sm:$0xff]  ;;  %v33_v11 = vld [vmem:[%s1350_s0 + $0x30] sm:$0xff] }
   0x4   :  { %v61_v10 = vpack.c.bf16 %v32_v9, %v31_v8  ;;  %v34_v12 = vld [vmem:[%s1350_s0 + $0x38] sm:$0xff]  ;;  %v35_v14 = vld [vmem:[%s1350_s0 + $0x40] sm:$0xff]  ;;  %v36_v15 = vld [vmem:[%s1350_s0 + $0x48] sm:$0xff] }
   0x5   :  { %v62_v13 = vpack.c.bf16 %v34_v12, %v33_v11  ;;  %v63_v16 = vpack.c.bf16 %v36_v15, %v35_v14  ;;  %v910_v17 = vld [vmem:[%s1353_s3 + $0x38] sm:$0xff]  ;;  %v37_v18 = vld [vmem:[%s1350_s0 + $0x50] sm:$0xff]  ;;  %v908_v22 = vld [vmem:[%s1353_s3 + $0x28] sm:$0xff] }
   0x6   :  { %151 = vmatpush.bf16.msra.mxu0 %v901_v1  ;;  %920 = vmatpush.bf16.msra.mxu3 %v901_v1  ;;  %v38_v19 = vld [vmem:[%s1350_s0 + $0x58] sm:$0xff]  ;;  %v909_v21 = vld [vmem:[%s1353_s3 + $0x30] sm:$0xff]  ;;  %v907_v23 = vld [vmem:[%s1353_s3 + $0x20] sm:$0xff] }
   0x7   :  { %349 = vmatpush.bf16.msra.mxu1 %v910_v17  ;;  %v64_v20 = vpack.c.bf16 %v38_v19, %v37_v18  ;;  %v39_v24 = vld [vmem:[%s1350_s0 + $0x60] sm:$0xff]  ;;  %v40_v25 = vld [vmem:[%s1350_s0 + $0x68] sm:$0xff]  ;;  %v906_v26 = vld [vmem:[%s1353_s3 + $0x18] sm:$0xff] }
   0x8   :  { %v65_v27 = vpack.c.bf16 %v40_v25, %v39_v24  ;;  %v905_v28 = vld [vmem:[%s1353_s3 + $0x10] sm:$0xff]  ;;  %v904_v29 = vld [vmem:[%s1353_s3 + $0x8] sm:$0xff]  ;;  %v903_v30 = vld [vmem:[%s1353_s3] sm:$0xff] }
   0x9   :  { %821 = vmatmul.msk.bf16.vlgmr.msra.gmra.mxu0 %vm95_vm0, %v59_v4  ;;  %v41_v31 = vld [vmem:[%s1350_s0 + $0x70] sm:$0xff]  ;;  %v42_v32 = vld [vmem:[%s1350_s0 + $0x78] sm:$0xff]  ;;  %v43_v34 = vld [vmem:[%s1350_s0 + $0x80] sm:$0xff] }
   0xa   :  { %921 = vmatpush.bf16.msrb.mxu3 %v910_v17  ;;  %v66_v33 = vpack.c.bf16 %v42_v32, %v41_v31  ;;  %v44_v35 = vld [vmem:[%s1350_s0 + $0x88] sm:$0xff]  ;;  %v1075_v38 = vld [vmem:[%s1352_s2] ss:$0 sm:$0xff]  ;;  %v45_v44 = vld [vmem:[%s1350_s0 + $0x90] sm:$0xff] }
   0xb   :  { %350 = vmatpush.bf16.msra.mxu1 %v909_v21  ;;  %v67_v36 = vpack.c.bf16 %v44_v35, %v43_v34  ;;  %v46_v45 = vld [vmem:[%s1350_s0 + $0x98] sm:$0xff]  ;;  %v47_v54 = vld [vmem:[%s1350_s0 + $0xa0] sm:$0xff]  ;;  %v48_v55 = vld [vmem:[%s1350_s0 + $0xa8] sm:$0xff] }
   0xc   :  { %v68_v47 = vpack.c.bf16 %v46_v45, %v45_v44  ;;  %v69_v57 = vpack.c.bf16 %v48_v55, %v47_v54  ;;  %v53_v59 = vld [vmem:[%s1350_s0 + $0xd0] sm:$0xff]  ;;  %v54_v60 = vld [vmem:[%s1350_s0 + $0xd8] sm:$0xff]  ;;  %v55_v8 = vld [vmem:[%s1350_s0 + $0xe0] sm:$0xff] }
   0xd   :  { %v72_v61 = vpack.c.bf16 %v54_v60, %v53_v59  ;;  %v49_v3 = vld [vmem:[%s1350_s0 + $0xb0] sm:$0xff]  ;;  %v50_v4 = vld [vmem:[%s1350_s0 + $0xb8] sm:$0xff]  ;;  %v56_v9 = vld [vmem:[%s1350_s0 + $0xe8] sm:$0xff] }
   0xe   :  { %922 = vmatpush.bf16.msrb.mxu3 %v909_v21  ;;  %v70_v6 = vpack.c.bf16 %v50_v4, %v49_v3  ;;  %v52_v17 = vld [vmem:[%s1350_s0 + $0xc8] sm:$0xff]  ;;  %v57_v21 = vld [vmem:[%s1350_s0 + $0xf0] sm:$0xff]  ;;  %v918_v34 = vld [vmem:[%s1355_s5 + $0x38] sm:$0xff] }
   0xf   :  { %351 = vmatpush.bf16.msra.mxu1 %v908_v22  ;;  %834 = vmatmul.msk.bf16.vlgmr.msra.gmra.mxu3 %vm95_vm0, %v72_v61  ;;  %v1172_v4 = vld [vmem:[%s1354_s4] ss:$0 sm:$0xff] }
  0x10   :  { %554 = vmatpush.bf16.msra.mxu2 %v918_v34 }
  0x12   :  { %923 = vmatpush.bf16.msrb.mxu3 %v908_v22  ;;  %v58_v22 = vld [vmem:[%s1350_s0 + $0xf8] sm:$0xff] }
  0x13   :  { %352 = vmatpush.bf16.msra.mxu1 %v907_v23 }
  0x16   :  { %924 = vmatpush.bf16.msrb.mxu3 %v907_v23  ;;  %v74_v23 = vpack.c.bf16 %v58_v22, %v57_v21 }
  0x17   :  { %353 = vmatpush.bf16.msra.mxu1 %v906_v26 }
  0x19   :  { %822 = vmatmul.msk.bf16.gmra.mxu0 %vm95_vm0, %v60_v7 }
  0x1a   :  { %925 = vmatpush.bf16.msrb.mxu3 %v906_v26 }
  0x1b   :  { %354 = vmatpush.bf16.msra.mxu1 %v905_v28 }
  0x1e   :  { %926 = vmatpush.bf16.msrb.mxu3 %v905_v28 }
  0x1f   :  { %355 = vmatpush.bf16.msra.mxu1 %v904_v29 }
  0x22   :  { %927 = vmatpush.bf16.msrb.mxu3 %v904_v29 }
  0x23   :  { %356 = vmatpush.bf16.msra.mxu1 %v903_v30 }
  0x26   :  { %928 = vmatpush.bf16.msrb.mxu3 %v903_v30 }
  0x29   :  { %823 = vmatmul.msk.bf16.gmra.mxu0 %vm95_vm0, %v61_v10  ;;  %v73_v10 = vpack.c.bf16 %v56_v9, %v55_v8 }
  0x2a   :  { %929 = vmatpush.bf16.msra.mxu3 %v918_v34 }
  0x2b   :  { %835 = vmatmul.msk.bf16.gmra.mxu3 %vm95_vm0, %v73_v10 }
  0x39   :  { %824 = vmatmul.msk.bf16.gmra.mxu0 %vm95_vm0, %v62_v13 }
  0x3b   :  { %836 = vmatmul.msk.bf16.gmra.mxu3 %vm95_vm0, %v74_v23 }
  0x49   :  { %825 = vmatmul.msk.bf16.gmra.mxu0 %vm95_vm0, %v63_v16  ;;  %v51_v16 = vld [vmem:[%s1350_s0 + $0xc0] sm:$0xff] }
  0x4a   :  { %v71_v19 = vpack.c.bf16 %v52_v17, %v51_v16 }
  0x59   :  { %826 = vmatmul.msk.bf16.gmra.mxu0 %vm95_vm0, %v64_v20 }
  0x69   :  { %827 = vmatmul.msk.bf16.gmra.mxu0 %vm95_vm0, %v65_v27 }
  0x79   :  { %828 = vmatmul.msk.bf16.gmra.mxu0 %vm95_vm0, %v66_v33 }
  0x86   :  { %v153_v37 = vpop.f32.mrf.mxu0 }
  0x87   :  { %v154_v39 = vadd.f32 %v1075_v38, %v153_v37 }
  0x89   :  { %829 = vmatmul.msk.bf16.gmra.mxu0 %vm95_vm0, %v67_v36  ;;  %v233_v42 = vmax.f32 %v154_v39, 0.0  ;;  %v917_v39 = vld [vmem:[%s1355_s5 + $0x30] sm:$0xff] }
  0x8a   :  { %555 = vmatpush.bf16.msra.mxu2 %v917_v39  ;;  %930 = vmatpush.bf16.msra.mxu3 %v917_v39 }
  0x8e   :  { %v155_v40 = vpop.f32.mrf.mxu0 }
  0x8f   :  { %v156_v41 = vadd.f32 %v1075_v38, %v155_v40 }
  0x91   :  { %v234_v43 = vmax.f32 %v156_v41, 0.0  ;;  %v916_v41 = vld [vmem:[%s1355_s5 + $0x28] sm:$0xff] }
  0x92   :  { %556 = vmatpush.bf16.msra.mxu2 %v916_v41  ;;  %931 = vmatpush.bf16.msra.mxu3 %v916_v41 }
  0x93   :  { %v265_v46 = vpack.c.bf16 %v234_v43, %v233_v42  ;;  %v915_v42 = vld [vmem:[%s1355_s5 + $0x20] sm:$0xff] }
  0x95   :  { %357 = vmatmul.bf16.vlgmr.msra.gmra.mxu1 %v265_v46  ;;  %v914_v46 = vld [vmem:[%s1355_s5 + $0x18] sm:$0xff] }
  0x96   :  { %v158_v48 = vpop.f32.mrf.mxu0  ;;  %557 = vmatpush.bf16.msra.mxu2 %v915_v42  ;;  %932 = vmatpush.bf16.msra.mxu3 %v915_v42 }
  0x97   :  { %v159_v49 = vadd.f32 %v1075_v38, %v158_v48 }
  0x99   :  { %830 = vmatmul.msk.bf16.gmra.mxu0 %vm95_vm0, %v68_v47  ;;  %v235_v52 = vmax.f32 %v159_v49, 0.0 }
  0x9a   :  { %558 = vmatpush.bf16.msra.mxu2 %v914_v46  ;;  %933 = vmatpush.bf16.msra.mxu3 %v914_v46 }
  0x9e   :  { %v160_v50 = vpop.f32.mrf.mxu0 }
  0x9f   :  { %v161_v51 = vadd.f32 %v1075_v38, %v160_v50  ;;  %v913_v50 = vld [vmem:[%s1355_s5 + $0x10] sm:$0xff] }
  0xa0   :  { %559 = vmatpush.bf16.msra.mxu2 %v913_v50  ;;  %934 = vmatpush.bf16.msra.mxu3 %v913_v50 }
  0xa1   :  { %v236_v53 = vmax.f32 %v161_v51, 0.0 }
  0xa3   :  { %v266_v56 = vpack.c.bf16 %v236_v53, %v235_v52  ;;  %v912_v52 = vld [vmem:[%s1355_s5 + $0x8] sm:$0xff]  ;;  %v911_v53 = vld [vmem:[%s1355_s5] sm:$0xff] }
  0xa4   :  { %560 = vmatpush.bf16.msra.mxu2 %v912_v52  ;;  %935 = vmatpush.bf16.msra.mxu3 %v912_v52 }
  0xa5   :  { %362 = vmatmul.bf16.gmra.mxu1 %v266_v56 }
  0xa6   :  { %v163_v58 = vpop.f32.mrf.mxu0 }
  0xa7   :  { %v164_v62 = vadd.f32 %v1075_v38, %v163_v58 }
  0xa8   :  { %561 = vmatpush.bf16.msra.mxu2 %v911_v53  ;;  %936 = vmatpush.bf16.msra.mxu3 %v911_v53 }
  0xa9   :  { %831 = vmatmul.msk.bf16.gmra.mxu0 %vm95_vm0, %v69_v57  ;;  %v237_v1 = vmax.f32 %v164_v62, 0.0 }
  0xae   :  { %v165_v63 = vpop.f32.mrf.mxu0 }
  0xaf   :  { %v166_v0 = vadd.f32 %v1075_v38, %v165_v63 }
  0xb1   :  { %v238_v2 = vmax.f32 %v166_v0, 0.0 }
  0xb3   :  { %v267_v5 = vpack.c.bf16 %v238_v2, %v237_v1 }
  0xb5   :  { %367 = vmatmul.bf16.gmra.mxu1 %v267_v5 }
  0xb6   :  { %v168_v7 = vpop.f32.mrf.mxu0 }
  0xb7   :  { %v169_v11 = vadd.f32 %v1075_v38, %v168_v7 }
  0xb9   :  { %832 = vmatmul.msk.bf16.gmra.mxu0 %vm95_vm0, %v70_v6  ;;  %v239_v14 = vmax.f32 %v169_v11, 0.0 }
  0xbe   :  { %v170_v12 = vpop.f32.mrf.mxu0 }
  0xbf   :  { %v171_v13 = vadd.f32 %v1075_v38, %v170_v12 }
  0xc1   :  { %v240_v15 = vmax.f32 %v171_v13, 0.0 }
  0xc3   :  { %v268_v18 = vpack.c.bf16 %v240_v15, %v239_v14 }
  0xc5   :  { %372 = vmatmul.bf16.gmra.mxu1 %v268_v18 }
  0xc6   :  { %v173_v20 = vpop.f32.mrf.mxu0 }
  0xc7   :  { %v174_v24 = vadd.f32 %v1075_v38, %v173_v20 }
  0xc9   :  { %833 = vmatmul.msk.bf16.gmra.mxu0 %vm95_vm0, %v71_v19  ;;  %v241_v27 = vmax.f32 %v174_v24, 0.0 }
  0xce   :  { %v175_v25 = vpop.f32.mrf.mxu0 }
  0xcf   :  { %v176_v26 = vadd.f32 %v1075_v38, %v175_v25 }
  0xd1   :  { %v242_v28 = vmax.f32 %v176_v26, 0.0 }
  0xd3   :  { %v269_v29 = vpack.c.bf16 %v242_v28, %v241_v27 }
  0xd5   :  { %377 = vmatmul.bf16.gmra.mxu1 %v269_v29 }
  0xd6   :  { %v178_v30 = vpop.f32.mrf.mxu0 }
  0xd7   :  { %v179_v31 = vadd.f32 %v1075_v38, %v178_v30 }
  0xd9   :  { %v243_v35 = vmax.f32 %v179_v31, 0.0 }
  0xde   :  { %v180_v32 = vpop.f32.mrf.mxu0 }
  0xdf   :  { %v181_v33 = vadd.f32 %v1075_v38, %v180_v32 }
  0xe1   :  { %v244_v36 = vmax.f32 %v181_v33, 0.0 }
  0xe3   :  { %v270_v37 = vpack.c.bf16 %v244_v36, %v243_v35 }
  0xe5   :  { %382 = vmatmul.bf16.gmra.mxu1 %v270_v37 }
  0xe6   :  { %v183_v40 = vpop.f32.mrf.mxu0 }
  0xe7   :  { %v184_v43 = vadd.f32 %v1075_v38, %v183_v40 }
  0xe9   :  { %v245_v47 = vmax.f32 %v184_v43, 0.0 }
  0xee   :  { %v185_v44 = vpop.f32.mrf.mxu0 }
  0xef   :  { %v186_v45 = vadd.f32 %v1075_v38, %v185_v44 }
  0xf1   :  { %v246_v48 = vmax.f32 %v186_v45, 0.0 }
  0xf3   :  { %v271_v49 = vpack.c.bf16 %v246_v48, %v245_v47 }
  0xf5   :  { %387 = vmatmul.bf16.gmra.mxu1 %v271_v49  ;;  %v218_v49 = vpop.f32.mrf.mxu3 }
  0xf6   :  { %v188_v51 = vpop.f32.mrf.mxu0 }
  0xf7   :  { %v189_v54 = vadd.f32 %v1075_v38, %v188_v51 }
  0xf9   :  { %v247_v57 = vmax.f32 %v189_v54, 0.0 }
  0xfe   :  { %v190_v55 = vpop.f32.mrf.mxu0 }
  0xff   :  { %v191_v56 = vadd.f32 %v1075_v38, %v190_v55 }
 0x101   :  { %v248_v58 = vmax.f32 %v191_v56, 0.0 }
 0x103   :  { %v272_v59 = vpack.c.bf16 %v248_v58, %v247_v57 }
 0x105   :  { %392 = vmatmul.bf16.gmra.mxu1 %v272_v59  ;;  %v220_v59 = vpop.f32.mrf.mxu3 }
 0x106   :  { %v193_v60 = vpop.f32.mrf.mxu0 }
 0x107   :  { %v194_v61 = vadd.f32 %v1075_v38, %v193_v60 }
 0x109   :  { %v249_v0 = vmax.f32 %v194_v61, 0.0 }
 0x10e   :  { %v195_v62 = vpop.f32.mrf.mxu0 }
 0x10f   :  { %v196_v63 = vadd.f32 %v1075_v38, %v195_v62 }
 0x111   :  { %v250_v1 = vmax.f32 %v196_v63, 0.0 }
 0x112   :  { %v358_v2 = vpop.f32.mrf.mxu1 }
 0x113   :  { %v273_v3 = vpack.c.bf16 %v250_v1, %v249_v0  ;;  %v359_v6 = vadd.f32 %v1172_v4, %v358_v2  ;;  %v223_v2 = vpop.f32.mrf.mxu3 }
 0x115   :  { %397 = vmatmul.bf16.gmra.mxu1 %v273_v3  ;;  %v438_v9 = vmax.f32 %v359_v6, 0.0  ;;  %v219_v3 = vadd.f32 %v1075_v38, %v218_v49 }
 0x116   :  { %v198_v5 = vpop.f32.mrf.mxu0 }
 0x117   :  { %v199_v10 = vadd.f32 %v1075_v38, %v198_v5  ;;  %v221_v5 = vadd.f32 %v1075_v38, %v220_v59 }
 0x119   :  { %v251_v15 = vmax.f32 %v199_v10, 0.0  ;;  %v260_v10 = vmax.f32 %v221_v5, 0.0 }
 0x11a   :  { %v360_v7 = vpop.f32.mrf.mxu1 }
 0x11b   :  { %v361_v8 = vadd.f32 %v1172_v4, %v360_v7 }
 0x11d   :  { %v439_v11 = vmax.f32 %v361_v8, 0.0 }
 0x11e   :  { %v200_v12 = vpop.f32.mrf.mxu0 }
 0x11f   :  { %v201_v13 = vadd.f32 %v1075_v38, %v200_v12  ;;  %v470_v14 = vpack.c.bf16 %v439_v11, %v438_v9  ;;  %v259_v9 = vmax.f32 %v219_v3, 0.0 }
 0x121   :  { %v252_v16 = vmax.f32 %v201_v13, 0.0  ;;  %562 = vmatmul.bf16.vlgmr.msra.gmra.mxu2 %v470_v14  ;;  %v278_v13 = vpack.c.bf16 %v260_v10, %v259_v9  ;;  %v225_v14 = vpop.f32.mrf.mxu3 }
 0x122   :  { %v363_v17 = vpop.f32.mrf.mxu1 }
 0x123   :  { %v274_v18 = vpack.c.bf16 %v252_v16, %v251_v15  ;;  %v364_v20 = vadd.f32 %v1172_v4, %v363_v17  ;;  %v224_v17 = vadd.f32 %v1075_v38, %v223_v2 }
 0x125   :  { %402 = vmatmul.bf16.gmra.mxu1 %v274_v18  ;;  %v440_v23 = vmax.f32 %v364_v20, 0.0  ;;  %v226_v18 = vadd.f32 %v1075_v38, %v225_v14 }
 0x126   :  { %v203_v19 = vpop.f32.mrf.mxu0 }
 0x127   :  { %v204_v24 = vadd.f32 %v1075_v38, %v203_v19 }
 0x129   :  { %v253_v29 = vmax.f32 %v204_v24, 0.0  ;;  %v262_v24 = vmax.f32 %v226_v18, 0.0 }
 0x12a   :  { %v365_v21 = vpop.f32.mrf.mxu1 }
 0x12b   :  { %v366_v22 = vadd.f32 %v1172_v4, %v365_v21 }
 0x12d   :  { %v441_v25 = vmax.f32 %v366_v22, 0.0  ;;  %v228_v22 = vpop.f32.mrf.mxu3 }
 0x12e   :  { %v205_v26 = vpop.f32.mrf.mxu0 }
 0x12f   :  { %v206_v27 = vadd.f32 %v1075_v38, %v205_v26  ;;  %v471_v28 = vpack.c.bf16 %v441_v25, %v440_v23  ;;  %v261_v23 = vmax.f32 %v224_v17, 0.0 }
 0x131   :  { %v254_v30 = vmax.f32 %v206_v27, 0.0  ;;  %567 = vmatmul.bf16.gmra.mxu2 %v471_v28  ;;  %v279_v27 = vpack.c.bf16 %v262_v24, %v261_v23 }
 0x132   :  { %v368_v31 = vpop.f32.mrf.mxu1 }
 0x133   :  { %v275_v32 = vpack.c.bf16 %v254_v30, %v253_v29  ;;  %v369_v34 = vadd.f32 %v1172_v4, %v368_v31  ;;  %v229_v31 = vadd.f32 %v1075_v38, %v228_v22 }
 0x135   :  { %407 = vmatmul.bf16.gmra.mxu1 %v275_v32  ;;  %v442_v37 = vmax.f32 %v369_v34, 0.0  ;;  %v230_v28 = vpop.f32.mrf.mxu3 }
 0x136   :  { %v208_v33 = vpop.f32.mrf.mxu0  ;;  %v231_v32 = vadd.f32 %v1075_v38, %v230_v28 }
 0x137   :  { %v209_v39 = vadd.f32 %v1075_v38, %v208_v33 }
 0x139   :  { %v255_v44 = vmax.f32 %v209_v39, 0.0 }
 0x13a   :  { %v370_v35 = vpop.f32.mrf.mxu1 }
 0x13b   :  { %v371_v36 = vadd.f32 %v1172_v4, %v370_v35 }
 0x13d   :  { %v443_v40 = vmax.f32 %v371_v36, 0.0  ;;  %v263_v36 = vmax.f32 %v229_v31, 0.0 }
 0x13e   :  { %v210_v41 = vpop.f32.mrf.mxu0 }
 0x13f   :  { %v211_v42 = vadd.f32 %v1075_v38, %v210_v41  ;;  %v472_v43 = vpack.c.bf16 %v443_v40, %v442_v37  ;;  %v264_v37 = vmax.f32 %v231_v32, 0.0 }
 0x141   :  { %v256_v45 = vmax.f32 %v211_v42, 0.0  ;;  %572 = vmatmul.bf16.gmra.mxu2 %v472_v43  ;;  %v280_v41 = vpack.c.bf16 %v264_v37, %v263_v36 }
 0x142   :  { %v373_v46 = vpop.f32.mrf.mxu1 }
 0x143   :  { %v276_v47 = vpack.c.bf16 %v256_v45, %v255_v44  ;;  %v374_v50 = vadd.f32 %v1172_v4, %v373_v46 }
 0x145   :  { %412 = vmatmul.bf16.gmra.mxu1 %v276_v47  ;;  %v444_v53 = vmax.f32 %v374_v50, 0.0 }
 0x146   :  { %v213_v48 = vpop.f32.mrf.mxu0 }
 0x147   :  { %v214_v54 = vadd.f32 %v1075_v38, %v213_v48 }
 0x149   :  { %v257_v60 = vmax.f32 %v214_v54, 0.0  ;;  %v1209_v54 = vld [vmem:[%s1356_s6] ss:$0 sm:$0xff] }
 0x14a   :  { %v375_v51 = vpop.f32.mrf.mxu1 }
 0x14b   :  { %v376_v52 = vadd.f32 %v1172_v4, %v375_v51 }
 0x14d   :  { %v445_v55 = vmax.f32 %v376_v52, 0.0 }
 0x14e   :  { %v215_v56 = vpop.f32.mrf.mxu0 }
 0x14f   :  { %v216_v57 = vadd.f32 %v1075_v38, %v215_v56  ;;  %v473_v58 = vpack.c.bf16 %v445_v55, %v444_v53 }
 0x151   :  { %v258_v61 = vmax.f32 %v216_v57, 0.0  ;;  %577 = vmatmul.bf16.gmra.mxu2 %v473_v58 }
 0x152   :  { %v378_v62 = vpop.f32.mrf.mxu1 }
 0x153   :  { %v277_v63 = vpack.c.bf16 %v258_v61, %v257_v60  ;;  %v379_v0 = vadd.f32 %v1172_v4, %v378_v62 }
 0x155   :  { %417 = vmatmul.bf16.vlgmr.msrb.gmra.mxu3 %v277_v63  ;;  %v446_v7 = vmax.f32 %v379_v0, 0.0 }
 0x15a   :  { %v380_v1 = vpop.f32.mrf.mxu1 }
 0x15b   :  { %v381_v6 = vadd.f32 %v1172_v4, %v380_v1 }
 0x15d   :  { %v447_v8 = vmax.f32 %v381_v6, 0.0 }
 0x15f   :  { %v474_v11 = vpack.c.bf16 %v447_v8, %v446_v7 }
 0x161   :  { %582 = vmatmul.bf16.gmra.mxu2 %v474_v11 }
 0x162   :  { %v383_v12 = vpop.f32.mrf.mxu1 }
 0x163   :  { %v384_v15 = vadd.f32 %v1172_v4, %v383_v12 }
 0x165   :  { %422 = vmatmul.bf16.gmra.mxu3 %v278_v13  ;;  %v448_v20 = vmax.f32 %v384_v15, 0.0 }
 0x16a   :  { %v385_v16 = vpop.f32.mrf.mxu1 }
 0x16b   :  { %v386_v19 = vadd.f32 %v1172_v4, %v385_v16 }
 0x16d   :  { %v449_v21 = vmax.f32 %v386_v19, 0.0 }
 0x16f   :  { %v475_v25 = vpack.c.bf16 %v449_v21, %v448_v20 }
 0x171   :  { %587 = vmatmul.bf16.gmra.mxu2 %v475_v25 }
 0x172   :  { %v388_v26 = vpop.f32.mrf.mxu1 }
 0x173   :  { %v389_v29 = vadd.f32 %v1172_v4, %v388_v26 }
 0x175   :  { %427 = vmatmul.bf16.gmra.mxu3 %v279_v27  ;;  %v450_v34 = vmax.f32 %v389_v29, 0.0 }
 0x17a   :  { %v390_v30 = vpop.f32.mrf.mxu1 }
 0x17b   :  { %v391_v33 = vadd.f32 %v1172_v4, %v390_v30 }
 0x17d   :  { %v451_v35 = vmax.f32 %v391_v33, 0.0 }
 0x17f   :  { %v476_v39 = vpack.c.bf16 %v451_v35, %v450_v34 }
 0x181   :  { %592 = vmatmul.bf16.gmra.mxu2 %v476_v39 }
 0x182   :  { %v393_v40 = vpop.f32.mrf.mxu1 }
 0x183   :  { %v394_v42 = vadd.f32 %v1172_v4, %v393_v40 }
 0x185   :  { %432 = vmatmul.bf16.gmra.mxu3 %v280_v41  ;;  %v452_v45 = vmax.f32 %v394_v42, 0.0 }
 0x18a   :  { %v395_v43 = vpop.f32.mrf.mxu1 }
 0x18b   :  { %v396_v44 = vadd.f32 %v1172_v4, %v395_v43 }
 0x18d   :  { %v453_v46 = vmax.f32 %v396_v44, 0.0 }
 0x18f   :  { %v477_v47 = vpack.c.bf16 %v453_v46, %v452_v45 }
 0x191   :  { %597 = vmatmul.bf16.gmra.mxu2 %v477_v47 }
 0x192   :  { %v398_v38 = vpop.f32.mrf.mxu1 }
 0x193   :  { %v399_v48 = vadd.f32 %v1172_v4, %v398_v38 }
 0x195   :  { %v454_v51 = vmax.f32 %v399_v48, 0.0 }
 0x19a   :  { %v400_v49 = vpop.f32.mrf.mxu1 }
 0x19b   :  { %v401_v50 = vadd.f32 %v1172_v4, %v400_v49 }
 0x19d   :  { %v455_v52 = vmax.f32 %v401_v50, 0.0 }
 0x19f   :  { %v478_v53 = vpack.c.bf16 %v455_v52, %v454_v51 }
 0x1a1   :  { %602 = vmatmul.bf16.gmra.mxu2 %v478_v53 }
 0x1a2   :  { %v403_v55 = vpop.f32.mrf.mxu1 }
 0x1a3   :  { %v404_v58 = vadd.f32 %v1172_v4, %v403_v55 }
 0x1a4   :  { %v563_v56 = vpop.f32.mrf.mxu2 }
 0x1a5   :  { %v564_v57 = vadd.f32 %v1209_v54, %v563_v56  ;;  %v456_v62 = vmax.f32 %v404_v58, 0.0 }
 0x1a7   :  { %644 = vst.msk [vmem:[#allocation2] sm:$0xff] %vm643_vm1, %v564_v57 }
 0x1aa   :  { %v405_v59 = vpop.f32.mrf.mxu1 }
 0x1ab   :  { %v406_v60 = vadd.f32 %v1172_v4, %v405_v59 }
 0x1ac   :  { %v565_v61 = vpop.f32.mrf.mxu2 }
 0x1ad   :  { %v457_v63 = vmax.f32 %v406_v60, 0.0  ;;  %v566_v0 = vadd.f32 %v1209_v54, %v565_v61 }
 0x1ae   :  { %v754_v1 = vld [vmem:[#allocation2] sm:$0xff] }
 0x1af   :  { %755 = vst [vmem:[%s1357_s7] sm:$0xff] %v754_v1  ;;  %v479_v2 = vpack.c.bf16 %v457_v63, %v456_v62 }
 0x1b0   :  { %645 = vst.msk [vmem:[#allocation2 + $0x8] sm:$0xff] %vm643_vm1, %v566_v0 }
 0x1b1   :  { %607 = vmatmul.bf16.gmra.mxu2 %v479_v2 }
 0x1b2   :  { %v408_v3 = vpop.f32.mrf.mxu1 }
 0x1b3   :  { %v409_v8 = vadd.f32 %v1172_v4, %v408_v3 }
 0x1b4   :  { %v568_v5 = vpop.f32.mrf.mxu2 }
 0x1b5   :  { %v569_v6 = vadd.f32 %v1209_v54, %v568_v5  ;;  %v458_v12 = vmax.f32 %v409_v8, 0.0 }
 0x1b7   :  { %v756_v7 = vld [vmem:[#allocation2 + $0x8] sm:$0xff]  ;;  %646 = vst.msk [vmem:[#allocation2 + $0x10] sm:$0xff] %vm643_vm1, %v569_v6 }
 0x1b8   :  { %757 = vst [vmem:[%s1357_s7 + $0x8] sm:$0xff] %v756_v7 }
 0x1ba   :  { %v410_v9 = vpop.f32.mrf.mxu1 }
 0x1bb   :  { %v411_v10 = vadd.f32 %v1172_v4, %v410_v9 }
 0x1bc   :  { %v570_v11 = vpop.f32.mrf.mxu2 }
 0x1bd   :  { %v459_v13 = vmax.f32 %v411_v10, 0.0  ;;  %v571_v14 = vadd.f32 %v1209_v54, %v570_v11 }
 0x1be   :  { %v758_v15 = vld [vmem:[#allocation2 + $0x10] sm:$0xff] }
 0x1bf   :  { %759 = vst [vmem:[%s1357_s7 + $0x10] sm:$0xff] %v758_v15  ;;  %v480_v16 = vpack.c.bf16 %v459_v13, %v458_v12 }
 0x1c0   :  { %647 = vst.msk [vmem:[#allocation2 + $0x18] sm:$0xff] %vm643_vm1, %v571_v14 }
 0x1c1   :  { %612 = vmatmul.bf16.gmra.mxu2 %v480_v16 }
 0x1c2   :  { %v413_v17 = vpop.f32.mrf.mxu1 }
 0x1c3   :  { %v414_v21 = vadd.f32 %v1172_v4, %v413_v17 }
 0x1c4   :  { %v573_v18 = vpop.f32.mrf.mxu2 }
 0x1c5   :  { %v574_v19 = vadd.f32 %v1209_v54, %v573_v18  ;;  %v460_v25 = vmax.f32 %v414_v21, 0.0 }
 0x1c7   :  { %v760_v20 = vld [vmem:[#allocation2 + $0x18] sm:$0xff]  ;;  %648 = vst.msk [vmem:[#allocation2 + $0x20] sm:$0xff] %vm643_vm1, %v574_v19 }
 0x1c8   :  { %761 = vst [vmem:[%s1357_s7 + $0x18] sm:$0xff] %v760_v20 }
 0x1ca   :  { %v415_v22 = vpop.f32.mrf.mxu1 }
 0x1cb   :  { %v416_v23 = vadd.f32 %v1172_v4, %v415_v22 }
 0x1cc   :  { %v575_v24 = vpop.f32.mrf.mxu2 }
 0x1cd   :  { %v461_v26 = vmax.f32 %v416_v23, 0.0  ;;  %v576_v27 = vadd.f32 %v1209_v54, %v575_v24 }
 0x1ce   :  { %v762_v28 = vld [vmem:[#allocation2 + $0x20] sm:$0xff] }
 0x1cf   :  { %763 = vst [vmem:[%s1357_s7 + $0x20] sm:$0xff] %v762_v28  ;;  %v481_v29 = vpack.c.bf16 %v461_v26, %v460_v25 }
 0x1d0   :  { %649 = vst.msk [vmem:[#allocation2 + $0x28] sm:$0xff] %vm643_vm1, %v576_v27 }
 0x1d1   :  { %617 = vmatmul.bf16.gmra.mxu2 %v481_v29 }
 0x1d4   :  { %v578_v30 = vpop.f32.mrf.mxu2 }
 0x1d5   :  { %v579_v31 = vadd.f32 %v1209_v54, %v578_v30 }
 0x1d7   :  { %v764_v32 = vld [vmem:[#allocation2 + $0x28] sm:$0xff]  ;;  %650 = vst.msk [vmem:[#allocation2 + $0x30] sm:$0xff] %vm643_vm1, %v579_v31 }
 0x1d8   :  { %765 = vst [vmem:[%s1357_s7 + $0x28] sm:$0xff] %v764_v32  ;;  %v418_v33 = vpop.f32.mrf.mxu3 }
 0x1d9   :  { %v419_v37 = vadd.f32 %v1172_v4, %v418_v33 }
 0x1db   :  { %v462_v41 = vmax.f32 %v419_v37, 0.0 }
 0x1dc   :  { %v580_v34 = vpop.f32.mrf.mxu2 }
 0x1dd   :  { %v581_v35 = vadd.f32 %v1209_v54, %v580_v34 }
 0x1de   :  { %v766_v36 = vld [vmem:[#allocation2 + $0x30] sm:$0xff] }
 0x1df   :  { %767 = vst [vmem:[%s1357_s7 + $0x30] sm:$0xff] %v766_v36 }
 0x1e0   :  { %651 = vst.msk [vmem:[#allocation2 + $0x38] sm:$0xff] %vm643_vm1, %v581_v35  ;;  %v420_v39 = vpop.f32.mrf.mxu3 }
 0x1e1   :  { %v421_v40 = vadd.f32 %v1172_v4, %v420_v39 }
 0x1e3   :  { %v463_v42 = vmax.f32 %v421_v40, 0.0 }
 0x1e4   :  { %v583_v43 = vpop.f32.mrf.mxu2 }
 0x1e5   :  { %v482_v44 = vpack.c.bf16 %v463_v42, %v462_v41  ;;  %v584_v45 = vadd.f32 %v1209_v54, %v583_v43 }
 0x1e7   :  { %v768_v46 = vld [vmem:[#allocation2 + $0x38] sm:$0xff]  ;;  %652 = vst.msk [vmem:[#allocation2 + $0x40] sm:$0xff] %vm643_vm1, %v584_v45  ;;  %622 = vmatmul.bf16.vlgmr.msra.gmra.mxu3 %v482_v44 }
 0x1e8   :  { %769 = vst [vmem:[%s1357_s7 + $0x38] sm:$0xff] %v768_v46  ;;  %v423_v47 = vpop.f32.mrf.mxu3 }
 0x1e9   :  { %v424_v50 = vadd.f32 %v1172_v4, %v423_v47 }
 0x1eb   :  { %v464_v53 = vmax.f32 %v424_v50, 0.0 }
 0x1ec   :  { %v585_v38 = vpop.f32.mrf.mxu2 }
 0x1ed   :  { %v586_v48 = vadd.f32 %v1209_v54, %v585_v38 }
 0x1ee   :  { %v770_v49 = vld [vmem:[#allocation2 + $0x40] sm:$0xff] }
 0x1ef   :  { %771 = vst [vmem:[%s1357_s7 + $0x40] sm:$0xff] %v770_v49 }
 0x1f0   :  { %653 = vst.msk [vmem:[#allocation2 + $0x48] sm:$0xff] %vm643_vm1, %v586_v48  ;;  %v425_v51 = vpop.f32.mrf.mxu3 }
 0x1f1   :  { %v426_v52 = vadd.f32 %v1172_v4, %v425_v51 }
 0x1f3   :  { %v465_v55 = vmax.f32 %v426_v52, 0.0 }
 0x1f4   :  { %v588_v56 = vpop.f32.mrf.mxu2 }
 0x1f5   :  { %v589_v57 = vadd.f32 %v1209_v54, %v588_v56  ;;  %v483_v58 = vpack.c.bf16 %v465_v55, %v464_v53 }
 0x1f7   :  { %v772_v59 = vld [vmem:[#allocation2 + $0x48] sm:$0xff]  ;;  %654 = vst.msk [vmem:[#allocation2 + $0x50] sm:$0xff] %vm643_vm1, %v589_v57  ;;  %627 = vmatmul.bf16.gmra.mxu3 %v483_v58 }
 0x1f8   :  { %773 = vst [vmem:[%s1357_s7 + $0x48] sm:$0xff] %v772_v59  ;;  %v428_v60 = vpop.f32.mrf.mxu3 }
 0x1f9   :  { %v429_v0 = vadd.f32 %v1172_v4, %v428_v60 }
 0x1fb   :  { %v466_v3 = vmax.f32 %v429_v0, 0.0 }
 0x1fc   :  { %v590_v61 = vpop.f32.mrf.mxu2 }
 0x1fd   :  { %v591_v62 = vadd.f32 %v1209_v54, %v590_v61 }
 0x1fe   :  { %v774_v63 = vld [vmem:[#allocation2 + $0x50] sm:$0xff] }
 0x1ff   :  { %775 = vst [vmem:[%s1357_s7 + $0x50] sm:$0xff] %v774_v63 }
 0x200   :  { %655 = vst.msk [vmem:[#allocation2 + $0x58] sm:$0xff] %vm643_vm1, %v591_v62  ;;  %v430_v1 = vpop.f32.mrf.mxu3 }
 0x201   :  { %v431_v2 = vadd.f32 %v1172_v4, %v430_v1 }
 0x203   :  { %v467_v5 = vmax.f32 %v431_v2, 0.0 }
 0x204   :  { %v593_v6 = vpop.f32.mrf.mxu2 }
 0x205   :  { %v594_v7 = vadd.f32 %v1209_v54, %v593_v6  ;;  %v484_v8 = vpack.c.bf16 %v467_v5, %v466_v3 }
 0x207   :  { %v776_v9 = vld [vmem:[#allocation2 + $0x58] sm:$0xff]  ;;  %656 = vst.msk [vmem:[#allocation2 + $0x60] sm:$0xff] %vm643_vm1, %v594_v7  ;;  %632 = vmatmul.bf16.gmra.mxu3 %v484_v8 }
 0x208   :  { %777 = vst [vmem:[%s1357_s7 + $0x58] sm:$0xff] %v776_v9  ;;  %v433_v10 = vpop.f32.mrf.mxu3 }
 0x209   :  { %v434_v14 = vadd.f32 %v1172_v4, %v433_v10 }
 0x20b   :  { %v468_v17 = vmax.f32 %v434_v14, 0.0 }
 0x20c   :  { %v595_v11 = vpop.f32.mrf.mxu2 }
 0x20d   :  { %v596_v12 = vadd.f32 %v1209_v54, %v595_v11 }
 0x20e   :  { %v778_v13 = vld [vmem:[#allocation2 + $0x60] sm:$0xff] }
 0x20f   :  { %779 = vst [vmem:[%s1357_s7 + $0x60] sm:$0xff] %v778_v13 }
 0x210   :  { %657 = vst.msk [vmem:[#allocation2 + $0x68] sm:$0xff] %vm643_vm1, %v596_v12  ;;  %v435_v15 = vpop.f32.mrf.mxu3 }
 0x211   :  { %v436_v16 = vadd.f32 %v1172_v4, %v435_v15 }
 0x213   :  { %v469_v18 = vmax.f32 %v436_v16, 0.0 }
 0x214   :  { %v598_v19 = vpop.f32.mrf.mxu2 }
 0x215   :  { %v599_v20 = vadd.f32 %v1209_v54, %v598_v19  ;;  %v485_v21 = vpack.c.bf16 %v469_v18, %v468_v17 }
 0x217   :  { %v780_v22 = vld [vmem:[#allocation2 + $0x68] sm:$0xff]  ;;  %658 = vst.msk [vmem:[#allocation2 + $0x70] sm:$0xff] %vm643_vm1, %v599_v20  ;;  %637 = vmatmul.bf16.gmra.mxu3 %v485_v21 }
 0x218   :  { %781 = vst [vmem:[%s1357_s7 + $0x68] sm:$0xff] %v780_v22 }
 0x21c   :  { %v600_v23 = vpop.f32.mrf.mxu2 }
 0x21d   :  { %v601_v24 = vadd.f32 %v1209_v54, %v600_v23 }
 0x21e   :  { %v782_v25 = vld [vmem:[#allocation2 + $0x70] sm:$0xff] }
 0x21f   :  { %783 = vst [vmem:[%s1357_s7 + $0x70] sm:$0xff] %v782_v25 }
 0x220   :  { %659 = vst.msk [vmem:[#allocation2 + $0x78] sm:$0xff] %vm643_vm1, %v601_v24 }
 0x224   :  { %v603_v4 = vpop.f32.mrf.mxu2 }
 0x225   :  { %v604_v26 = vadd.f32 %v1209_v54, %v603_v4 }
 0x227   :  { %v784_v27 = vld [vmem:[#allocation2 + $0x78] sm:$0xff]  ;;  %660 = vst.msk [vmem:[#allocation2 + $0x80] sm:$0xff] %vm643_vm1, %v604_v26 }
 0x228   :  { %785 = vst [vmem:[%s1357_s7 + $0x78] sm:$0xff] %v784_v27 }
 0x22c   :  { %v605_v28 = vpop.f32.mrf.mxu2 }
 0x22d   :  { %v606_v29 = vadd.f32 %v1209_v54, %v605_v28 }
 0x22e   :  { %v786_v30 = vld [vmem:[#allocation2 + $0x80] sm:$0xff] }
 0x22f   :  { %787 = vst [vmem:[%s1357_s7 + $0x80] sm:$0xff] %v786_v30 }
 0x230   :  { %661 = vst.msk [vmem:[#allocation2 + $0x88] sm:$0xff] %vm643_vm1, %v606_v29 }
 0x234   :  { %v608_v31 = vpop.f32.mrf.mxu2 }
 0x235   :  { %v609_v32 = vadd.f32 %v1209_v54, %v608_v31 }
 0x237   :  { %v788_v33 = vld [vmem:[#allocation2 + $0x88] sm:$0xff]  ;;  %662 = vst.msk [vmem:[#allocation2 + $0x90] sm:$0xff] %vm643_vm1, %v609_v32 }
 0x238   :  { %789 = vst [vmem:[%s1357_s7 + $0x88] sm:$0xff] %v788_v33 }
 0x23c   :  { %v610_v34 = vpop.f32.mrf.mxu2 }
 0x23d   :  { %v611_v35 = vadd.f32 %v1209_v54, %v610_v34 }
 0x23e   :  { %v790_v36 = vld [vmem:[#allocation2 + $0x90] sm:$0xff] }
 0x23f   :  { %791 = vst [vmem:[%s1357_s7 + $0x90] sm:$0xff] %v790_v36 }
 0x240   :  { %663 = vst.msk [vmem:[#allocation2 + $0x98] sm:$0xff] %vm643_vm1, %v611_v35 }
 0x244   :  { %v613_v37 = vpop.f32.mrf.mxu2 }
 0x245   :  { %v614_v39 = vadd.f32 %v1209_v54, %v613_v37 }
 0x247   :  { %v792_v40 = vld [vmem:[#allocation2 + $0x98] sm:$0xff]  ;;  %664 = vst.msk [vmem:[#allocation2 + $0xa0] sm:$0xff] %vm643_vm1, %v614_v39 }
 0x248   :  { %793 = vst [vmem:[%s1357_s7 + $0x98] sm:$0xff] %v792_v40 }
 0x24c   :  { %v615_v41 = vpop.f32.mrf.mxu2 }
 0x24d   :  { %v616_v42 = vadd.f32 %v1209_v54, %v615_v41 }
 0x24e   :  { %v794_v43 = vld [vmem:[#allocation2 + $0xa0] sm:$0xff] }
 0x24f   :  { %795 = vst [vmem:[%s1357_s7 + $0xa0] sm:$0xff] %v794_v43 }
 0x250   :  { %665 = vst.msk [vmem:[#allocation2 + $0xa8] sm:$0xff] %vm643_vm1, %v616_v42 }
 0x254   :  { %v618_v44 = vpop.f32.mrf.mxu2 }
 0x255   :  { %v619_v45 = vadd.f32 %v1209_v54, %v618_v44 }
 0x257   :  { %v796_v46 = vld [vmem:[#allocation2 + $0xa8] sm:$0xff]  ;;  %666 = vst.msk [vmem:[#allocation2 + $0xb0] sm:$0xff] %vm643_vm1, %v619_v45 }
 0x258   :  { %797 = vst [vmem:[%s1357_s7 + $0xa8] sm:$0xff] %v796_v46 }
 0x25c   :  { %v620_v47 = vpop.f32.mrf.mxu2 }
 0x25d   :  { %v621_v38 = vadd.f32 %v1209_v54, %v620_v47 }
 0x25e   :  { %v798_v48 = vld [vmem:[#allocation2 + $0xb0] sm:$0xff] }
 0x25f   :  { %799 = vst [vmem:[%s1357_s7 + $0xb0] sm:$0xff] %v798_v48 }
 0x260   :  { %667 = vst.msk [vmem:[#allocation2 + $0xb8] sm:$0xff] %vm643_vm1, %v621_v38 }
 0x267   :  { %v800_v49 = vld [vmem:[#allocation2 + $0xb8] sm:$0xff] }
 0x268   :  { %801 = vst [vmem:[%s1357_s7 + $0xb8] sm:$0xff] %v800_v49 }
 0x26a   :  { %v623_v50 = vpop.f32.mrf.mxu3 }
 0x26b   :  { %v624_v51 = vadd.f32 %v1209_v54, %v623_v50 }
 0x26d   :  { %668 = vst.msk [vmem:[#allocation2 + $0xc0] sm:$0xff] %vm643_vm1, %v624_v51 }
 0x272   :  { %v625_v52 = vpop.f32.mrf.mxu3 }
 0x274   :  { %v802_v53 = vld [vmem:[#allocation2 + $0xc0] sm:$0xff] }
 0x275   :  { %803 = vst [vmem:[%s1357_s7 + $0xc0] sm:$0xff] %v802_v53 }
 0x27a   :  { %v628_v55 = vpop.f32.mrf.mxu3 }
 0x282   :  { %v630_v56 = vpop.f32.mrf.mxu3 }
 0x28a   :  { %v633_v57 = vpop.f32.mrf.mxu3 }
 0x292   :  { %v635_v58 = vpop.f32.mrf.mxu3 }
 0x29a   :  { %v638_v59 = vpop.f32.mrf.mxu3 }
 0x2a2   :  { %v640_v60 = vpop.f32.mrf.mxu3 }

</bundles_post_ra>
